<compile_context>
chip_gen: v5e
topology: v5e:2x2
jax: 0.10.0
libtpu: 0.0.40
codegen_flags: <defaults>
</compile_context>

<pallas_src>
import numpy as np
import jax
import jax.numpy as jnp
from jax.experimental import pallas as pl
from jax.experimental.pallas import tpu as pltpu


def _nf_kernel(x_ref, w1_ref, b1_ref, w2_ref, b2_ref, w3_ref, b3_ref,
               w4_ref, b4_ref, out_ref):
    K = w1_ref.shape[0]
    m, dim = x_ref.shape
    out_w = out_ref.shape[1]

    # Clear the padding lanes once; real data overwrites the live lanes below.
    out_ref[...] = jnp.zeros((m, out_w), jnp.float32)

    S = x_ref[...]                                   # running state, in vregs
    s_tot = jnp.zeros((m, dim), jnp.float32)         # accumulated log-scales

    for k in range(K):                               # K static -> fully unrolled
        h = jnp.dot(S, w1_ref[k], preferred_element_type=jnp.float32) + b1_ref[k]
        h = jnp.where(h > 0, h, 0.2 * h)
        h = jnp.dot(h, w2_ref[k], preferred_element_type=jnp.float32) + b2_ref[k]
        h = jnp.where(h > 0, h, 0.2 * h)
        h = jnp.dot(h, w3_ref[k], preferred_element_type=jnp.float32) + b3_ref[k]
        h = jnp.where(h > 0, h, 0.2 * h)
        st = jnp.dot(h, w4_ref[k], preferred_element_type=jnp.float32) + b4_ref[k]

        s_scat = st[:, :dim]      # log-scale scattered to the transformed lanes
        t_scat = st[:, dim:]      # shift      scattered to the transformed lanes
        # Copy lanes have s=0, t=0  ->  exp(0)*x + 0 = x  (the identity half).
        S = jnp.exp(s_scat) * S + t_scat
        s_tot = s_tot + s_scat
        out_ref[:, k * dim:(k + 1) * dim] = S

    # Single cross-lane reduction for log_det (instead of one per flow).
    out_ref[:, K * dim:K * dim + 1] = jnp.sum(s_tot, axis=1, keepdims=True)


def _build_folded_params(Ws, Bs, parities, dim):
    """Fold de-interleave / parity / concat permutations into fused s|t MLPs.

    Ws: list of 4 arrays (K, 2, fin, fout); Bs: list of 4 arrays (K, 2, 1, fout),
    index 0 = s_cond, index 1 = t_cond. Returns stacked folded weights and, per
    flow, the inverse permutation mapping the kernel's internal state layout
    back to the reference column order.
    """
    K = len(parities)
    d2 = dim // 2
    nh = Ws[0].shape[-1]
    even = np.arange(0, dim, 2)
    odd = np.arange(1, dim, 2)

    W1l, B1l, W2l, B2l, W3l, B3l, W4l, B4l = ([] for _ in range(8))
    inv_perms = []
    perm = np.arange(dim)                     # internal lane i holds z[:, perm[i]]

    for k, p in enumerate(parities):
        a = odd if p else even                # half fed to the MLPs (copied)
        b = even if p else odd                # half that is affinely transformed
        c0 = np.arange(d2, dim) if p else np.arange(0, d2)   # where copy goes
        c1 = np.arange(0, d2) if p else np.arange(d2, dim)   # where transform goes
        invp = np.argsort(perm)               # reference col -> internal lane

        W1s, W1t = np.asarray(Ws[0][k, 0]), np.asarray(Ws[0][k, 1])
        W2s, W2t = np.asarray(Ws[1][k, 0]), np.asarray(Ws[1][k, 1])
        W3s, W3t = np.asarray(Ws[2][k, 0]), np.asarray(Ws[2][k, 1])
        W4s, W4t = np.asarray(Ws[3][k, 0]), np.asarray(Ws[3][k, 1])
        b1s, b1t = np.asarray(Bs[0][k, 0, 0]), np.asarray(Bs[0][k, 1, 0])
        b2s, b2t = np.asarray(Bs[1][k, 0, 0]), np.asarray(Bs[1][k, 1, 0])
        b3s, b3t = np.asarray(Bs[2][k, 0, 0]), np.asarray(Bs[2][k, 1, 0])
        b4s, b4t = np.asarray(Bs[3][k, 0, 0]), np.asarray(Bs[3][k, 1, 0])

        # Layer 1: fold the x0 selection (in the current internal layout) into rows.
        w1 = np.zeros((dim, 2 * nh), np.float32)
        w1[invp[a], :nh] = W1s
        w1[invp[a], nh:] = W1t
        b1 = np.concatenate([b1s, b1t])[None, :]

        # Layers 2-3: block-diagonal so s- and t-chains stay independent.
        w2 = np.zeros((2 * nh, 2 * nh), np.float32)
        w2[:nh, :nh] = W2s
        w2[nh:, nh:] = W2t
        b2 = np.concatenate([b2s, b2t])[None, :]

        w3 = np.zeros((2 * nh, 2 * nh), np.float32)
        w3[:nh, :nh] = W3s
        w3[nh:, nh:] = W3t
        b3 = np.concatenate([b3s, b3t])[None, :]

        # Layer 4: scatter s and t to the lanes where x1 lives; copy lanes -> 0.
        tr = invp[b]
        w4 = np.zeros((2 * nh, 2 * dim), np.float32)
        w4[:nh, tr] = W4s
        w4[nh:, dim + tr] = W4t
        b4 = np.zeros((1, 2 * dim), np.float32)
        b4[0, tr] = b4s
        b4[0, dim + tr] = b4t

        W1l.append(w1); B1l.append(b1); W2l.append(w2); B2l.append(b2)
        W3l.append(w3); B3l.append(b3); W4l.append(w4); B4l.append(b4)

        # Reference column map of this flow: a[j] -> c0[j] (copy), b[j] -> c1[j].
        phi = np.empty(dim, np.int64)
        phi[a] = c0
        phi[b] = c1
        perm = phi[perm]                      # kernel never permutes; track it here
        inv_perms.append(np.argsort(perm))

    stacked = tuple(jnp.asarray(np.stack(x)) for x in
                    (W1l, B1l, W2l, B2l, W3l, B3l, W4l, B4l))
    return stacked, inv_perms


def normalizing_flow_forward(x, Ws, Bs, parities):
    m, dim = x.shape
    K = len(parities)
    (w1, b1, w2, b2, w3, b3, w4, b4), inv_perms = _build_folded_params(
        Ws, Bs, parities, dim)

    # Lane-dense packed output: [z_1 | z_2 | ... | z_K | log_det | zero pad].
    out_w = 128 * ((K * dim + 1 + 127) // 128)

    # Batch tiling: "parallel" axis so large m shards across TensorCores (v7x);
    # at small m this is a single grid step with everything resident in VMEM.
    bm = m if m <= 512 else 512
    grid = (pl.cdiv(m, bm),)

    full = lambda i: (0, 0, 0)
    packed = pl.pallas_call(
        _nf_kernel,
        out_shape=jax.ShapeDtypeStruct((m, out_w), jnp.float32),
        grid=grid,
        in_specs=[
            pl.BlockSpec((bm, dim), lambda i: (i, 0)),
            pl.BlockSpec(w1.shape, full),
            pl.BlockSpec(b1.shape, full),
            pl.BlockSpec(w2.shape, full),
            pl.BlockSpec(b2.shape, full),
            pl.BlockSpec(w3.shape, full),
            pl.BlockSpec(b3.shape, full),
            pl.BlockSpec(w4.shape, full),
            pl.BlockSpec(b4.shape, full),
        ],
        out_specs=pl.BlockSpec((bm, out_w), lambda i: (i, 0)),
        compiler_params=pltpu.CompilerParams(
            dimension_semantics=("parallel",)),
    )(x, w1, b1, w2, b2, w3, b3, w4, b4)

    # Un-permute each flow's state back to the reference column order (pure XLA).
    zs = [x]
    for k in range(K):
        zs.append(packed[:, k * dim:(k + 1) * dim][:, inv_perms[k]])
    log_det = packed[:, K * dim]
    return zs, log_det


def init_params(key, K, dim, nh):
    """Deterministic PyTorch-Linear-style init; weights stored (in, out)."""
    d2 = dim // 2
    layer_shapes = [(d2, nh), (nh, nh), (nh, nh), (nh, d2)]
    Ws, Bs = [], []
    for (fin, fout) in layer_shapes:
        key, kw, kb = jax.random.split(key, 3)
        bound = 1.0 / np.sqrt(fin)
        W = jax.random.uniform(kw, (K, 2, fin, fout), jnp.float32, -bound, bound)
        b = jax.random.uniform(kb, (K, 2, 1, fout), jnp.float32, -bound, bound)
        Ws.append(W)
        Bs.append(b)
    return Ws, Bs


def reference_forward(x, Ws, Bs, parities):
    """Pure-JAX reference reproducing the PyTorch semantics exactly."""
    def mlp(h, k, which):
        for li in range(4):
            h = jnp.dot(h, Ws[li][k, which],
                        precision=jax.lax.Precision.HIGHEST) + Bs[li][k, which, 0]
            if li < 3:
                h = jnp.where(h > 0, h, 0.2 * h)
        return h

    m = x.shape[0]
    log_det = jnp.zeros((m,), jnp.float32)
    zs = [x]
    for k, p in enumerate(parities):
        x0, x1 = x[:, ::2], x[:, 1::2]
        if p:
            x0, x1 = x1, x0
        s = mlp(x0, k, 0)
        t = mlp(x0, k, 1)
        z0 = x0
        z1 = jnp.exp(s) * x1 + t
        if p:
            z0, z1 = z1, z0
        x = jnp.concatenate([z0, z1], axis=1)
        log_det = log_det + jnp.sum(s, axis=1)
        zs.append(x)
    return zs, log_det


if __name__ == "__main__":
    K, m, dim, nh = 4, 8, 16, 32          # flows, batch, features, MLP hidden
    parities = [k % 2 for k in range(K)]

    key = jax.random.PRNGKey(0)
    key, kx = jax.random.split(key)
    x = jax.random.normal(kx, (m, dim), jnp.float32)
    Ws, Bs = init_params(key, K, dim, nh)

    zs, log_det = normalizing_flow_forward(x, Ws, Bs, parities)
    jax.block_until_ready(log_det)
    jax.block_until_ready(zs[-1])

    zs_ref, ld_ref = reference_forward(x, Ws, Bs, parities)
    for a, b in zip(zs, zs_ref):
        np.testing.assert_allclose(np.asarray(a), np.asarray(b), rtol=1e-5, atol=1e-5)
    np.testing.assert_allclose(np.asarray(log_det), np.asarray(ld_ref),
                               rtol=1e-5, atol=1e-5)

    print("KERNEL_OK")
</pallas_src>

<mosaic_0001>
module attributes {stable_mosaic.version = 11 : i64} {
  func.func @_nf_kernel(%arg0: i32, %arg1: memref<8x16xf32, #tpu.memory_space<vmem>>, %arg2: memref<4x16x64xf32, #tpu.memory_space<vmem>>, %arg3: memref<4x1x64xf32, #tpu.memory_space<vmem>>, %arg4: memref<4x64x64xf32, #tpu.memory_space<vmem>>, %arg5: memref<4x1x64xf32, #tpu.memory_space<vmem>>, %arg6: memref<4x64x64xf32, #tpu.memory_space<vmem>>, %arg7: memref<4x1x64xf32, #tpu.memory_space<vmem>>, %arg8: memref<4x64x32xf32, #tpu.memory_space<vmem>>, %arg9: memref<4x1x32xf32, #tpu.memory_space<vmem>>, %arg10: memref<8x128xf32, #tpu.memory_space<vmem>>) attributes {dimension_semantics = [#tpu.dimension_semantics<parallel>], iteration_bounds = array<i64: 1>, scalar_prefetch = 0 : i64, scratch_operands = 0 : i64, tpu.core_type = #tpu.core_type<tc>, window_params = [{transform_indices = @transform_0, window_bounds = array<i64: 8, 16>}, {pipeline_mode = #tpu.pipeline_mode<synchronous>, transform_indices = @transform_1, window_bounds = array<i64: 4, 16, 64>}, {pipeline_mode = #tpu.pipeline_mode<synchronous>, transform_indices = @transform_2, window_bounds = array<i64: 4, 1, 64>}, {pipeline_mode = #tpu.pipeline_mode<synchronous>, transform_indices = @transform_3, window_bounds = array<i64: 4, 64, 64>}, {pipeline_mode = #tpu.pipeline_mode<synchronous>, transform_indices = @transform_4, window_bounds = array<i64: 4, 1, 64>}, {pipeline_mode = #tpu.pipeline_mode<synchronous>, transform_indices = @transform_5, window_bounds = array<i64: 4, 64, 64>}, {pipeline_mode = #tpu.pipeline_mode<synchronous>, transform_indices = @transform_6, window_bounds = array<i64: 4, 1, 64>}, {pipeline_mode = #tpu.pipeline_mode<synchronous>, transform_indices = @transform_7, window_bounds = array<i64: 4, 64, 32>}, {pipeline_mode = #tpu.pipeline_mode<synchronous>, transform_indices = @transform_8, window_bounds = array<i64: 4, 1, 32>}, {transform_indices = @transform_9, window_bounds = array<i64: 8, 128>}]} {
    %cst = arith.constant 0.000000e+00 : f32
    %0 = vector.broadcast %cst : f32 to vector<8x128xf32>
    %c0 = arith.constant 0 : index
    %c0_0 = arith.constant 0 : index
    %1 = vector.load %arg10[%c0, %c0_0] : memref<8x128xf32, #tpu.memory_space<vmem>>, vector<8x128xf32>
    tpu.vector_store %arg10[%c0, %c0_0], %0 {strides = array<i32>} : memref<8x128xf32, #tpu.memory_space<vmem>>, vector<8x128xf32>,
    %c0_1 = arith.constant 0 : index
    %c0_2 = arith.constant 0 : index
    %2 = vector.load %arg1[%c0_1, %c0_2] : memref<8x16xf32, #tpu.memory_space<vmem>>, vector<8x16xf32>
    %cst_3 = arith.constant 0.000000e+00 : f32
    %3 = vector.broadcast %cst_3 : f32 to vector<8x16xf32>
    %c0_4 = arith.constant 0 : index
    %c0_5 = arith.constant 0 : index
    %c0_6 = arith.constant 0 : index
    %4 = vector.load %arg2[%c0_4, %c0_5, %c0_6] : memref<4x16x64xf32, #tpu.memory_space<vmem>>, vector<1x16x64xf32>
    %5 = vector.shape_cast %4 : vector<1x16x64xf32> to vector<16x64xf32>
    %cst_7 = arith.constant dense<0.000000e+00> : vector<8x64xf32>
    %6 = tpu.matmul %2, %5, %cst_7 {dimension_numbers = #tpu.dot_dimension_numbers<[1], [0], [0], [1], [0, 0, 1, 1], [], []>} : vector<8x16xf32>, vector<16x64xf32>, vector<8x64xf32> -> vector<8x64xf32>
    %c0_8 = arith.constant 0 : index
    %c0_9 = arith.constant 0 : index
    %c0_10 = arith.constant 0 : index
    %7 = vector.load %arg3[%c0_8, %c0_9, %c0_10] : memref<4x1x64xf32, #tpu.memory_space<vmem>>, vector<1x1x64xf32>
    %8 = vector.shape_cast %7 : vector<1x1x64xf32> to vector<1x64xf32>
    %9 = vector.broadcast %8 : vector<1x64xf32> to vector<8x64xf32>
    %10 = arith.addf %6, %9 : vector<8x64xf32>
    %cst_11 = arith.constant 0.000000e+00 : f32
    %11 = vector.broadcast %cst_11 : f32 to vector<8x64xf32>
    %12 = arith.cmpf ogt, %10, %11 : vector<8x64xf32>
    %cst_12 = arith.constant 2.000000e-01 : f32
    %13 = vector.broadcast %cst_12 : f32 to vector<8x64xf32>
    %14 = arith.mulf %13, %10 : vector<8x64xf32>
    %15 = arith.select %12, %10, %14 : vector<8x64xi1>, vector<8x64xf32>
    %c0_13 = arith.constant 0 : index
    %c0_14 = arith.constant 0 : index
    %c0_15 = arith.constant 0 : index
    %16 = vector.load %arg4[%c0_13, %c0_14, %c0_15] : memref<4x64x64xf32, #tpu.memory_space<vmem>>, vector<1x64x64xf32>
    %17 = vector.shape_cast %16 : vector<1x64x64xf32> to vector<64x64xf32>
    %cst_16 = arith.constant dense<0.000000e+00> : vector<8x64xf32>
    %18 = tpu.matmul %15, %17, %cst_16 {dimension_numbers = #tpu.dot_dimension_numbers<[1], [0], [0], [1], [0, 0, 1, 1], [], []>} : vector<8x64xf32>, vector<64x64xf32>, vector<8x64xf32> -> vector<8x64xf32>
    %c0_17 = arith.constant 0 : index
    %c0_18 = arith.constant 0 : index
    %c0_19 = arith.constant 0 : index
    %19 = vector.load %arg5[%c0_17, %c0_18, %c0_19] : memref<4x1x64xf32, #tpu.memory_space<vmem>>, vector<1x1x64xf32>
    %20 = vector.shape_cast %19 : vector<1x1x64xf32> to vector<1x64xf32>
    %21 = vector.broadcast %20 : vector<1x64xf32> to vector<8x64xf32>
    %22 = arith.addf %18, %21 : vector<8x64xf32>
    %cst_20 = arith.constant 0.000000e+00 : f32
    %23 = vector.broadcast %cst_20 : f32 to vector<8x64xf32>
    %24 = arith.cmpf ogt, %22, %23 : vector<8x64xf32>
    %cst_21 = arith.constant 2.000000e-01 : f32
    %25 = vector.broadcast %cst_21 : f32 to vector<8x64xf32>
    %26 = arith.mulf %25, %22 : vector<8x64xf32>
    %27 = arith.select %24, %22, %26 : vector<8x64xi1>, vector<8x64xf32>
    %c0_22 = arith.constant 0 : index
    %c0_23 = arith.constant 0 : index
    %c0_24 = arith.constant 0 : index
    %28 = vector.load %arg6[%c0_22, %c0_23, %c0_24] : memref<4x64x64xf32, #tpu.memory_space<vmem>>, vector<1x64x64xf32>
    %29 = vector.shape_cast %28 : vector<1x64x64xf32> to vector<64x64xf32>
    %cst_25 = arith.constant dense<0.000000e+00> : vector<8x64xf32>
    %30 = tpu.matmul %27, %29, %cst_25 {dimension_numbers = #tpu.dot_dimension_numbers<[1], [0], [0], [1], [0, 0, 1, 1], [], []>} : vector<8x64xf32>, vector<64x64xf32>, vector<8x64xf32> -> vector<8x64xf32>
    %c0_26 = arith.constant 0 : index
    %c0_27 = arith.constant 0 : index
    %c0_28 = arith.constant 0 : index
    %31 = vector.load %arg7[%c0_26, %c0_27, %c0_28] : memref<4x1x64xf32, #tpu.memory_space<vmem>>, vector<1x1x64xf32>
    %32 = vector.shape_cast %31 : vector<1x1x64xf32> to vector<1x64xf32>
    %33 = vector.broadcast %32 : vector<1x64xf32> to vector<8x64xf32>
    %34 = arith.addf %30, %33 : vector<8x64xf32>
    %cst_29 = arith.constant 0.000000e+00 : f32
    %35 = vector.broadcast %cst_29 : f32 to vector<8x64xf32>
    %36 = arith.cmpf ogt, %34, %35 : vector<8x64xf32>
    %cst_30 = arith.constant 2.000000e-01 : f32
    %37 = vector.broadcast %cst_30 : f32 to vector<8x64xf32>
    %38 = arith.mulf %37, %34 : vector<8x64xf32>
    %39 = arith.select %36, %34, %38 : vector<8x64xi1>, vector<8x64xf32>
    %c0_31 = arith.constant 0 : index
    %c0_32 = arith.constant 0 : index
    %c0_33 = arith.constant 0 : index
    %40 = vector.load %arg8[%c0_31, %c0_32, %c0_33] : memref<4x64x32xf32, #tpu.memory_space<vmem>>, vector<1x64x32xf32>
    %41 = vector.shape_cast %40 : vector<1x64x32xf32> to vector<64x32xf32>
    %cst_34 = arith.constant dense<0.000000e+00> : vector<8x32xf32>
    %42 = tpu.matmul %39, %41, %cst_34 {dimension_numbers = #tpu.dot_dimension_numbers<[1], [0], [0], [1], [0, 0, 1, 1], [], []>} : vector<8x64xf32>, vector<64x32xf32>, vector<8x32xf32> -> vector<8x32xf32>
    %c0_35 = arith.constant 0 : index
    %c0_36 = arith.constant 0 : index
    %c0_37 = arith.constant 0 : index
    %43 = vector.load %arg9[%c0_35, %c0_36, %c0_37] : memref<4x1x32xf32, #tpu.memory_space<vmem>>, vector<1x1x32xf32>
    %44 = vector.shape_cast %43 : vector<1x1x32xf32> to vector<1x32xf32>
    %45 = vector.broadcast %44 : vector<1x32xf32> to vector<8x32xf32>
    %46 = arith.addf %42, %45 : vector<8x32xf32>
    %47 = vector.extract_strided_slice %46 {offsets = [0, 0], sizes = [8, 16], strides = [1, 1]} : vector<8x32xf32> to vector<8x16xf32>
    %48 = vector.extract_strided_slice %46 {offsets = [0, 16], sizes = [8, 16], strides = [1, 1]} : vector<8x32xf32> to vector<8x16xf32>
    %49 = math.exp %47 : vector<8x16xf32>
    %50 = arith.mulf %49, %2 : vector<8x16xf32>
    %51 = arith.addf %50, %48 : vector<8x16xf32>
    %52 = arith.addf %3, %47 : vector<8x16xf32>
    %c0_38 = arith.constant 0 : index
    %c0_39 = arith.constant 0 : index
    %53 = vector.load %arg10[%c0_38, %c0_39] : memref<8x128xf32, #tpu.memory_space<vmem>>, vector<8x16xf32>
    tpu.vector_store %arg10[%c0_38, %c0_39], %51 {strides = array<i32>} : memref<8x128xf32, #tpu.memory_space<vmem>>, vector<8x16xf32>,
    %c1 = arith.constant 1 : index
    %c0_40 = arith.constant 0 : index
    %c0_41 = arith.constant 0 : index
    %54 = vector.load %arg2[%c1, %c0_40, %c0_41] : memref<4x16x64xf32, #tpu.memory_space<vmem>>, vector<1x16x64xf32>
    %55 = vector.shape_cast %54 : vector<1x16x64xf32> to vector<16x64xf32>
    %cst_42 = arith.constant dense<0.000000e+00> : vector<8x64xf32>
    %56 = tpu.matmul %51, %55, %cst_42 {dimension_numbers = #tpu.dot_dimension_numbers<[1], [0], [0], [1], [0, 0, 1, 1], [], []>} : vector<8x16xf32>, vector<16x64xf32>, vector<8x64xf32> -> vector<8x64xf32>
    %c1_43 = arith.constant 1 : index
    %c0_44 = arith.constant 0 : index
    %c0_45 = arith.constant 0 : index
    %57 = vector.load %arg3[%c1_43, %c0_44, %c0_45] : memref<4x1x64xf32, #tpu.memory_space<vmem>>, vector<1x1x64xf32>
    %58 = vector.shape_cast %57 : vector<1x1x64xf32> to vector<1x64xf32>
    %59 = vector.broadcast %58 : vector<1x64xf32> to vector<8x64xf32>
    %60 = arith.addf %56, %59 : vector<8x64xf32>
    %cst_46 = arith.constant 0.000000e+00 : f32
    %61 = vector.broadcast %cst_46 : f32 to vector<8x64xf32>
    %62 = arith.cmpf ogt, %60, %61 : vector<8x64xf32>
    %cst_47 = arith.constant 2.000000e-01 : f32
    %63 = vector.broadcast %cst_47 : f32 to vector<8x64xf32>
    %64 = arith.mulf %63, %60 : vector<8x64xf32>
    %65 = arith.select %62, %60, %64 : vector<8x64xi1>, vector<8x64xf32>
    %c1_48 = arith.constant 1 : index
    %c0_49 = arith.constant 0 : index
    %c0_50 = arith.constant 0 : index
    %66 = vector.load %arg4[%c1_48, %c0_49, %c0_50] : memref<4x64x64xf32, #tpu.memory_space<vmem>>, vector<1x64x64xf32>
    %67 = vector.shape_cast %66 : vector<1x64x64xf32> to vector<64x64xf32>
    %cst_51 = arith.constant dense<0.000000e+00> : vector<8x64xf32>
    %68 = tpu.matmul %65, %67, %cst_51 {dimension_numbers = #tpu.dot_dimension_numbers<[1], [0], [0], [1], [0, 0, 1, 1], [], []>} : vector<8x64xf32>, vector<64x64xf32>, vector<8x64xf32> -> vector<8x64xf32>
    %c1_52 = arith.constant 1 : index
    %c0_53 = arith.constant 0 : index
    %c0_54 = arith.constant 0 : index
    %69 = vector.load %arg5[%c1_52, %c0_53, %c0_54] : memref<4x1x64xf32, #tpu.memory_space<vmem>>, vector<1x1x64xf32>
    %70 = vector.shape_cast %69 : vector<1x1x64xf32> to vector<1x64xf32>
    %71 = vector.broadcast %70 : vector<1x64xf32> to vector<8x64xf32>
    %72 = arith.addf %68, %71 : vector<8x64xf32>
    %cst_55 = arith.constant 0.000000e+00 : f32
    %73 = vector.broadcast %cst_55 : f32 to vector<8x64xf32>
    %74 = arith.cmpf ogt, %72, %73 : vector<8x64xf32>
    %cst_56 = arith.constant 2.000000e-01 : f32
    %75 = vector.broadcast %cst_56 : f32 to vector<8x64xf32>
    %76 = arith.mulf %75, %72 : vector<8x64xf32>
    %77 = arith.select %74, %72, %76 : vector<8x64xi1>, vector<8x64xf32>
    %c1_57 = arith.constant 1 : index
    %c0_58 = arith.constant 0 : index
    %c0_59 = arith.constant 0 : index
    %78 = vector.load %arg6[%c1_57, %c0_58, %c0_59] : memref<4x64x64xf32, #tpu.memory_space<vmem>>, vector<1x64x64xf32>
    %79 = vector.shape_cast %78 : vector<1x64x64xf32> to vector<64x64xf32>
    %cst_60 = arith.constant dense<0.000000e+00> : vector<8x64xf32>
    %80 = tpu.matmul %77, %79, %cst_60 {dimension_numbers = #tpu.dot_dimension_numbers<[1], [0], [0], [1], [0, 0, 1, 1], [], []>} : vector<8x64xf32>, vector<64x64xf32>, vector<8x64xf32> -> vector<8x64xf32>
    %c1_61 = arith.constant 1 : index
    %c0_62 = arith.constant 0 : index
    %c0_63 = arith.constant 0 : index
    %81 = vector.load %arg7[%c1_61, %c0_62, %c0_63] : memref<4x1x64xf32, #tpu.memory_space<vmem>>, vector<1x1x64xf32>
    %82 = vector.shape_cast %81 : vector<1x1x64xf32> to vector<1x64xf32>
    %83 = vector.broadcast %82 : vector<1x64xf32> to vector<8x64xf32>
    %84 = arith.addf %80, %83 : vector<8x64xf32>
    %cst_64 = arith.constant 0.000000e+00 : f32
    %85 = vector.broadcast %cst_64 : f32 to vector<8x64xf32>
    %86 = arith.cmpf ogt, %84, %85 : vector<8x64xf32>
    %cst_65 = arith.constant 2.000000e-01 : f32
    %87 = vector.broadcast %cst_65 : f32 to vector<8x64xf32>
    %88 = arith.mulf %87, %84 : vector<8x64xf32>
    %89 = arith.select %86, %84, %88 : vector<8x64xi1>, vector<8x64xf32>
    %c1_66 = arith.constant 1 : index
    %c0_67 = arith.constant 0 : index
    %c0_68 = arith.constant 0 : index
    %90 = vector.load %arg8[%c1_66, %c0_67, %c0_68] : memref<4x64x32xf32, #tpu.memory_space<vmem>>, vector<1x64x32xf32>
    %91 = vector.shape_cast %90 : vector<1x64x32xf32> to vector<64x32xf32>
    %cst_69 = arith.constant dense<0.000000e+00> : vector<8x32xf32>
    %92 = tpu.matmul %89, %91, %cst_69 {dimension_numbers = #tpu.dot_dimension_numbers<[1], [0], [0], [1], [0, 0, 1, 1], [], []>} : vector<8x64xf32>, vector<64x32xf32>, vector<8x32xf32> -> vector<8x32xf32>
    %c1_70 = arith.constant 1 : index
    %c0_71 = arith.constant 0 : index
    %c0_72 = arith.constant 0 : index
    %93 = vector.load %arg9[%c1_70, %c0_71, %c0_72] : memref<4x1x32xf32, #tpu.memory_space<vmem>>, vector<1x1x32xf32>
    %94 = vector.shape_cast %93 : vector<1x1x32xf32> to vector<1x32xf32>
    %95 = vector.broadcast %94 : vector<1x32xf32> to vector<8x32xf32>
    %96 = arith.addf %92, %95 : vector<8x32xf32>
    %97 = vector.extract_strided_slice %96 {offsets = [0, 0], sizes = [8, 16], strides = [1, 1]} : vector<8x32xf32> to vector<8x16xf32>
    %98 = vector.extract_strided_slice %96 {offsets = [0, 16], sizes = [8, 16], strides = [1, 1]} : vector<8x32xf32> to vector<8x16xf32>
    %99 = math.exp %97 : vector<8x16xf32>
    %100 = arith.mulf %99, %51 : vector<8x16xf32>
    %101 = arith.addf %100, %98 : vector<8x16xf32>
    %102 = arith.addf %52, %97 : vector<8x16xf32>
    %c0_73 = arith.constant 0 : index
    %c16 = arith.constant 16 : index
    %103 = vector.load %arg10[%c0_73, %c16] : memref<8x128xf32, #tpu.memory_space<vmem>>, vector<8x16xf32>
    tpu.vector_store %arg10[%c0_73, %c16], %101 {strides = array<i32>} : memref<8x128xf32, #tpu.memory_space<vmem>>, vector<8x16xf32>,
    %c2 = arith.constant 2 : index
    %c0_74 = arith.constant 0 : index
    %c0_75 = arith.constant 0 : index
    %104 = vector.load %arg2[%c2, %c0_74, %c0_75] : memref<4x16x64xf32, #tpu.memory_space<vmem>>, vector<1x16x64xf32>
    %105 = vector.shape_cast %104 : vector<1x16x64xf32> to vector<16x64xf32>
    %cst_76 = arith.constant dense<0.000000e+00> : vector<8x64xf32>
    %106 = tpu.matmul %101, %105, %cst_76 {dimension_numbers = #tpu.dot_dimension_numbers<[1], [0], [0], [1], [0, 0, 1, 1], [], []>} : vector<8x16xf32>, vector<16x64xf32>, vector<8x64xf32> -> vector<8x64xf32>
    %c2_77 = arith.constant 2 : index
    %c0_78 = arith.constant 0 : index
    %c0_79 = arith.constant 0 : index
    %107 = vector.load %arg3[%c2_77, %c0_78, %c0_79] : memref<4x1x64xf32, #tpu.memory_space<vmem>>, vector<1x1x64xf32>
    %108 = vector.shape_cast %107 : vector<1x1x64xf32> to vector<1x64xf32>
    %109 = vector.broadcast %108 : vector<1x64xf32> to vector<8x64xf32>
    %110 = arith.addf %106, %109 : vector<8x64xf32>
    %cst_80 = arith.constant 0.000000e+00 : f32
    %111 = vector.broadcast %cst_80 : f32 to vector<8x64xf32>
    %112 = arith.cmpf ogt, %110, %111 : vector<8x64xf32>
    %cst_81 = arith.constant 2.000000e-01 : f32
    %113 = vector.broadcast %cst_81 : f32 to vector<8x64xf32>
    %114 = arith.mulf %113, %110 : vector<8x64xf32>
    %115 = arith.select %112, %110, %114 : vector<8x64xi1>, vector<8x64xf32>
    %c2_82 = arith.constant 2 : index
    %c0_83 = arith.constant 0 : index
    %c0_84 = arith.constant 0 : index
    %116 = vector.load %arg4[%c2_82, %c0_83, %c0_84] : memref<4x64x64xf32, #tpu.memory_space<vmem>>, vector<1x64x64xf32>
    %117 = vector.shape_cast %116 : vector<1x64x64xf32> to vector<64x64xf32>
    %cst_85 = arith.constant dense<0.000000e+00> : vector<8x64xf32>
    %118 = tpu.matmul %115, %117, %cst_85 {dimension_numbers = #tpu.dot_dimension_numbers<[1], [0], [0], [1], [0, 0, 1, 1], [], []>} : vector<8x64xf32>, vector<64x64xf32>, vector<8x64xf32> -> vector<8x64xf32>
    %c2_86 = arith.constant 2 : index
    %c0_87 = arith.constant 0 : index
    %c0_88 = arith.constant 0 : index
    %119 = vector.load %arg5[%c2_86, %c0_87, %c0_88] : memref<4x1x64xf32, #tpu.memory_space<vmem>>, vector<1x1x64xf32>
    %120 = vector.shape_cast %119 : vector<1x1x64xf32> to vector<1x64xf32>
    %121 = vector.broadcast %120 : vector<1x64xf32> to vector<8x64xf32>
    %122 = arith.addf %118, %121 : vector<8x64xf32>
    %cst_89 = arith.constant 0.000000e+00 : f32
    %123 = vector.broadcast %cst_89 : f32 to vector<8x64xf32>
    %124 = arith.cmpf ogt, %122, %123 : vector<8x64xf32>
    %cst_90 = arith.constant 2.000000e-01 : f32
    %125 = vector.broadcast %cst_90 : f32 to vector<8x64xf32>
    %126 = arith.mulf %125, %122 : vector<8x64xf32>
    %127 = arith.select %124, %122, %126 : vector<8x64xi1>, vector<8x64xf32>
    %c2_91 = arith.constant 2 : index
    %c0_92 = arith.constant 0 : index
    %c0_93 = arith.constant 0 : index
    %128 = vector.load %arg6[%c2_91, %c0_92, %c0_93] : memref<4x64x64xf32, #tpu.memory_space<vmem>>, vector<1x64x64xf32>
    %129 = vector.shape_cast %128 : vector<1x64x64xf32> to vector<64x64xf32>
    %cst_94 = arith.constant dense<0.000000e+00> : vector<8x64xf32>
    %130 = tpu.matmul %127, %129, %cst_94 {dimension_numbers = #tpu.dot_dimension_numbers<[1], [0], [0], [1], [0, 0, 1, 1], [], []>} : vector<8x64xf32>, vector<64x64xf32>, vector<8x64xf32> -> vector<8x64xf32>
    %c2_95 = arith.constant 2 : index
    %c0_96 = arith.constant 0 : index
    %c0_97 = arith.constant 0 : index
    %131 = vector.load %arg7[%c2_95, %c0_96, %c0_97] : memref<4x1x64xf32, #tpu.memory_space<vmem>>, vector<1x1x64xf32>
    %132 = vector.shape_cast %131 : vector<1x1x64xf32> to vector<1x64xf32>
    %133 = vector.broadcast %132 : vector<1x64xf32> to vector<8x64xf32>
    %134 = arith.addf %130, %133 : vector<8x64xf32>
    %cst_98 = arith.constant 0.000000e+00 : f32
    %135 = vector.broadcast %cst_98 : f32 to vector<8x64xf32>
    %136 = arith.cmpf ogt, %134, %135 : vector<8x64xf32>
    %cst_99 = arith.constant 2.000000e-01 : f32
    %137 = vector.broadcast %cst_99 : f32 to vector<8x64xf32>
    %138 = arith.mulf %137, %134 : vector<8x64xf32>
    %139 = arith.select %136, %134, %138 : vector<8x64xi1>, vector<8x64xf32>
    %c2_100 = arith.constant 2 : index
    %c0_101 = arith.constant 0 : index
    %c0_102 = arith.constant 0 : index
    %140 = vector.load %arg8[%c2_100, %c0_101, %c0_102] : memref<4x64x32xf32, #tpu.memory_space<vmem>>, vector<1x64x32xf32>
    %141 = vector.shape_cast %140 : vector<1x64x32xf32> to vector<64x32xf32>
    %cst_103 = arith.constant dense<0.000000e+00> : vector<8x32xf32>
    %142 = tpu.matmul %139, %141, %cst_103 {dimension_numbers = #tpu.dot_dimension_numbers<[1], [0], [0], [1], [0, 0, 1, 1], [], []>} : vector<8x64xf32>, vector<64x32xf32>, vector<8x32xf32> -> vector<8x32xf32>
    %c2_104 = arith.constant 2 : index
    %c0_105 = arith.constant 0 : index
    %c0_106 = arith.constant 0 : index
    %143 = vector.load %arg9[%c2_104, %c0_105, %c0_106] : memref<4x1x32xf32, #tpu.memory_space<vmem>>, vector<1x1x32xf32>
    %144 = vector.shape_cast %143 : vector<1x1x32xf32> to vector<1x32xf32>
    %145 = vector.broadcast %144 : vector<1x32xf32> to vector<8x32xf32>
    %146 = arith.addf %142, %145 : vector<8x32xf32>
    %147 = vector.extract_strided_slice %146 {offsets = [0, 0], sizes = [8, 16], strides = [1, 1]} : vector<8x32xf32> to vector<8x16xf32>
    %148 = vector.extract_strided_slice %146 {offsets = [0, 16], sizes = [8, 16], strides = [1, 1]} : vector<8x32xf32> to vector<8x16xf32>
    %149 = math.exp %147 : vector<8x16xf32>
    %150 = arith.mulf %149, %101 : vector<8x16xf32>
    %151 = arith.addf %150, %148 : vector<8x16xf32>
    %152 = arith.addf %102, %147 : vector<8x16xf32>
    %c0_107 = arith.constant 0 : index
    %c32 = arith.constant 32 : index
    %153 = vector.load %arg10[%c0_107, %c32] : memref<8x128xf32, #tpu.memory_space<vmem>>, vector<8x16xf32>
    tpu.vector_store %arg10[%c0_107, %c32], %151 {strides = array<i32>} : memref<8x128xf32, #tpu.memory_space<vmem>>, vector<8x16xf32>,
    %c3 = arith.constant 3 : index
    %c0_108 = arith.constant 0 : index
    %c0_109 = arith.constant 0 : index
    %154 = vector.load %arg2[%c3, %c0_108, %c0_109] : memref<4x16x64xf32, #tpu.memory_space<vmem>>, vector<1x16x64xf32>
    %155 = vector.shape_cast %154 : vector<1x16x64xf32> to vector<16x64xf32>
    %cst_110 = arith.constant dense<0.000000e+00> : vector<8x64xf32>
    %156 = tpu.matmul %151, %155, %cst_110 {dimension_numbers = #tpu.dot_dimension_numbers<[1], [0], [0], [1], [0, 0, 1, 1], [], []>} : vector<8x16xf32>, vector<16x64xf32>, vector<8x64xf32> -> vector<8x64xf32>
    %c3_111 = arith.constant 3 : index
    %c0_112 = arith.constant 0 : index
    %c0_113 = arith.constant 0 : index
    %157 = vector.load %arg3[%c3_111, %c0_112, %c0_113] : memref<4x1x64xf32, #tpu.memory_space<vmem>>, vector<1x1x64xf32>
    %158 = vector.shape_cast %157 : vector<1x1x64xf32> to vector<1x64xf32>
    %159 = vector.broadcast %158 : vector<1x64xf32> to vector<8x64xf32>
    %160 = arith.addf %156, %159 : vector<8x64xf32>
    %cst_114 = arith.constant 0.000000e+00 : f32
    %161 = vector.broadcast %cst_114 : f32 to vector<8x64xf32>
    %162 = arith.cmpf ogt, %160, %161 : vector<8x64xf32>
    %cst_115 = arith.constant 2.000000e-01 : f32
    %163 = vector.broadcast %cst_115 : f32 to vector<8x64xf32>
    %164 = arith.mulf %163, %160 : vector<8x64xf32>
    %165 = arith.select %162, %160, %164 : vector<8x64xi1>, vector<8x64xf32>
    %c3_116 = arith.constant 3 : index
    %c0_117 = arith.constant 0 : index
    %c0_118 = arith.constant 0 : index
    %166 = vector.load %arg4[%c3_116, %c0_117, %c0_118] : memref<4x64x64xf32, #tpu.memory_space<vmem>>, vector<1x64x64xf32>
    %167 = vector.shape_cast %166 : vector<1x64x64xf32> to vector<64x64xf32>
    %cst_119 = arith.constant dense<0.000000e+00> : vector<8x64xf32>
    %168 = tpu.matmul %165, %167, %cst_119 {dimension_numbers = #tpu.dot_dimension_numbers<[1], [0], [0], [1], [0, 0, 1, 1], [], []>} : vector<8x64xf32>, vector<64x64xf32>, vector<8x64xf32> -> vector<8x64xf32>
    %c3_120 = arith.constant 3 : index
    %c0_121 = arith.constant 0 : index
    %c0_122 = arith.constant 0 : index
    %169 = vector.load %arg5[%c3_120, %c0_121, %c0_122] : memref<4x1x64xf32, #tpu.memory_space<vmem>>, vector<1x1x64xf32>
    %170 = vector.shape_cast %169 : vector<1x1x64xf32> to vector<1x64xf32>
    %171 = vector.broadcast %170 : vector<1x64xf32> to vector<8x64xf32>
    %172 = arith.addf %168, %171 : vector<8x64xf32>
    %cst_123 = arith.constant 0.000000e+00 : f32
    %173 = vector.broadcast %cst_123 : f32 to vector<8x64xf32>
    %174 = arith.cmpf ogt, %172, %173 : vector<8x64xf32>
    %cst_124 = arith.constant 2.000000e-01 : f32
    %175 = vector.broadcast %cst_124 : f32 to vector<8x64xf32>
    %176 = arith.mulf %175, %172 : vector<8x64xf32>
    %177 = arith.select %174, %172, %176 : vector<8x64xi1>, vector<8x64xf32>
    %c3_125 = arith.constant 3 : index
    %c0_126 = arith.constant 0 : index
    %c0_127 = arith.constant 0 : index
    %178 = vector.load %arg6[%c3_125, %c0_126, %c0_127] : memref<4x64x64xf32, #tpu.memory_space<vmem>>, vector<1x64x64xf32>
    %179 = vector.shape_cast %178 : vector<1x64x64xf32> to vector<64x64xf32>
    %cst_128 = arith.constant dense<0.000000e+00> : vector<8x64xf32>
    %180 = tpu.matmul %177, %179, %cst_128 {dimension_numbers = #tpu.dot_dimension_numbers<[1], [0], [0], [1], [0, 0, 1, 1], [], []>} : vector<8x64xf32>, vector<64x64xf32>, vector<8x64xf32> -> vector<8x64xf32>
    %c3_129 = arith.constant 3 : index
    %c0_130 = arith.constant 0 : index
    %c0_131 = arith.constant 0 : index
    %181 = vector.load %arg7[%c3_129, %c0_130, %c0_131] : memref<4x1x64xf32, #tpu.memory_space<vmem>>, vector<1x1x64xf32>
    %182 = vector.shape_cast %181 : vector<1x1x64xf32> to vector<1x64xf32>
    %183 = vector.broadcast %182 : vector<1x64xf32> to vector<8x64xf32>
    %184 = arith.addf %180, %183 : vector<8x64xf32>
    %cst_132 = arith.constant 0.000000e+00 : f32
    %185 = vector.broadcast %cst_132 : f32 to vector<8x64xf32>
    %186 = arith.cmpf ogt, %184, %185 : vector<8x64xf32>
    %cst_133 = arith.constant 2.000000e-01 : f32
    %187 = vector.broadcast %cst_133 : f32 to vector<8x64xf32>
    %188 = arith.mulf %187, %184 : vector<8x64xf32>
    %189 = arith.select %186, %184, %188 : vector<8x64xi1>, vector<8x64xf32>
    %c3_134 = arith.constant 3 : index
    %c0_135 = arith.constant 0 : index
    %c0_136 = arith.constant 0 : index
    %190 = vector.load %arg8[%c3_134, %c0_135, %c0_136] : memref<4x64x32xf32, #tpu.memory_space<vmem>>, vector<1x64x32xf32>
    %191 = vector.shape_cast %190 : vector<1x64x32xf32> to vector<64x32xf32>
    %cst_137 = arith.constant dense<0.000000e+00> : vector<8x32xf32>
    %192 = tpu.matmul %189, %191, %cst_137 {dimension_numbers = #tpu.dot_dimension_numbers<[1], [0], [0], [1], [0, 0, 1, 1], [], []>} : vector<8x64xf32>, vector<64x32xf32>, vector<8x32xf32> -> vector<8x32xf32>
    %c3_138 = arith.constant 3 : index
    %c0_139 = arith.constant 0 : index
    %c0_140 = arith.constant 0 : index
    %193 = vector.load %arg9[%c3_138, %c0_139, %c0_140] : memref<4x1x32xf32, #tpu.memory_space<vmem>>, vector<1x1x32xf32>
    %194 = vector.shape_cast %193 : vector<1x1x32xf32> to vector<1x32xf32>
    %195 = vector.broadcast %194 : vector<1x32xf32> to vector<8x32xf32>
    %196 = arith.addf %192, %195 : vector<8x32xf32>
    %197 = vector.extract_strided_slice %196 {offsets = [0, 0], sizes = [8, 16], strides = [1, 1]} : vector<8x32xf32> to vector<8x16xf32>
    %198 = vector.extract_strided_slice %196 {offsets = [0, 16], sizes = [8, 16], strides = [1, 1]} : vector<8x32xf32> to vector<8x16xf32>
    %199 = math.exp %197 : vector<8x16xf32>
    %200 = arith.mulf %199, %151 : vector<8x16xf32>
    %201 = arith.addf %200, %198 : vector<8x16xf32>
    %202 = arith.addf %152, %197 : vector<8x16xf32>
    %c0_141 = arith.constant 0 : index
    %c48 = arith.constant 48 : index
    %203 = vector.load %arg10[%c0_141, %c48] : memref<8x128xf32, #tpu.memory_space<vmem>>, vector<8x16xf32>
    tpu.vector_store %arg10[%c0_141, %c48], %201 {strides = array<i32>} : memref<8x128xf32, #tpu.memory_space<vmem>>, vector<8x16xf32>,
    %cst_142 = arith.constant dense<0.000000e+00> : vector<8xf32>
    %204 = vector.multi_reduction <add>, %202, %cst_142 [1] : vector<8x16xf32> to vector<8xf32>
    %205 = vector.shape_cast %204 : vector<8xf32> to vector<8x1xf32>
    %c0_143 = arith.constant 0 : index
    %c64 = arith.constant 64 : index
    %206 = vector.load %arg10[%c0_143, %c64] : memref<8x128xf32, #tpu.memory_space<vmem>>, vector<8x1xf32>
    tpu.vector_store %arg10[%c0_143, %c64], %205 {strides = array<i32>} : memref<8x128xf32, #tpu.memory_space<vmem>>, vector<8x1xf32>,
    return
  }
  func.func @transform_0(%arg0: i32) -> (i32, i32) {
    %c0_i32 = arith.constant 0 : i32
    %c0_i32_0 = arith.constant 0 : i32
    return %arg0, %c0_i32 : i32, i32
  }
  func.func @transform_1(%arg0: i32) -> (i32, i32, i32) {
    %c0_i32 = arith.constant 0 : i32
    %c0_i32_0 = arith.constant 0 : i32
    %c0_i32_1 = arith.constant 0 : i32
    %c0_i32_2 = arith.constant 0 : i32
    return %c0_i32, %c0_i32_0, %c0_i32_1 : i32, i32, i32
  }
  func.func @transform_2(%arg0: i32) -> (i32, i32, i32) {
    %c0_i32 = arith.constant 0 : i32
    %c0_i32_0 = arith.constant 0 : i32
    %c0_i32_1 = arith.constant 0 : i32
    %c0_i32_2 = arith.constant 0 : i32
    return %c0_i32, %c0_i32_0, %c0_i32_1 : i32, i32, i32
  }
  func.func @transform_3(%arg0: i32) -> (i32, i32, i32) {
    %c0_i32 = arith.constant 0 : i32
    %c0_i32_0 = arith.constant 0 : i32
    %c0_i32_1 = arith.constant 0 : i32
    %c0_i32_2 = arith.constant 0 : i32
    return %c0_i32, %c0_i32_0, %c0_i32_1 : i32, i32, i32
  }
  func.func @transform_4(%arg0: i32) -> (i32, i32, i32) {
    %c0_i32 = arith.constant 0 : i32
    %c0_i32_0 = arith.constant 0 : i32
    %c0_i32_1 = arith.constant 0 : i32
    %c0_i32_2 = arith.constant 0 : i32
    return %c0_i32, %c0_i32_0, %c0_i32_1 : i32, i32, i32
  }
  func.func @transform_5(%arg0: i32) -> (i32, i32, i32) {
    %c0_i32 = arith.constant 0 : i32
    %c0_i32_0 = arith.constant 0 : i32
    %c0_i32_1 = arith.constant 0 : i32
    %c0_i32_2 = arith.constant 0 : i32
    return %c0_i32, %c0_i32_0, %c0_i32_1 : i32, i32, i32
  }
  func.func @transform_6(%arg0: i32) -> (i32, i32, i32) {
    %c0_i32 = arith.constant 0 : i32
    %c0_i32_0 = arith.constant 0 : i32
    %c0_i32_1 = arith.constant 0 : i32
    %c0_i32_2 = arith.constant 0 : i32
    return %c0_i32, %c0_i32_0, %c0_i32_1 : i32, i32, i32
  }
  func.func @transform_7(%arg0: i32) -> (i32, i32, i32) {
    %c0_i32 = arith.constant 0 : i32
    %c0_i32_0 = arith.constant 0 : i32
    %c0_i32_1 = arith.constant 0 : i32
    %c0_i32_2 = arith.constant 0 : i32
    return %c0_i32, %c0_i32_0, %c0_i32_1 : i32, i32, i32
  }
  func.func @transform_8(%arg0: i32) -> (i32, i32, i32) {
    %c0_i32 = arith.constant 0 : i32
    %c0_i32_0 = arith.constant 0 : i32
    %c0_i32_1 = arith.constant 0 : i32
    %c0_i32_2 = arith.constant 0 : i32
    return %c0_i32, %c0_i32_0, %c0_i32_1 : i32, i32, i32
  }
  func.func @transform_9(%arg0: i32) -> (i32, i32) {
    %c0_i32 = arith.constant 0 : i32
    %c0_i32_0 = arith.constant 0 : i32
    return %arg0, %c0_i32 : i32, i32
  }
}

</mosaic_0001>

<bundles_post_ra>
// kernel: tpu_custom_call.1
= control target key start
LH: loop header
LB: loop body
LE: loop exit
PB: predicated region body
PF: predicated region fallthrough
CT: control target
= control target key end

     0   :  { %14 = vsyncpa [#allocation3], 0  ;;  %s1277_s0 = inlined_call_operand.vmem [shape: f32[8,16], index: 0, kind: input, shape index: {}]   ;;  %s1278_s1 = inlined_call_operand.vmem [shape: f32[4,16,64], index: 1, kind: input, shape index: {}]   ;;  %s1279_s2 = inlined_call_operand.vmem [shape: f32[4,1,64], index: 2, kind: input, shape index: {}]   ;;  %s1280_s3 = inlined_call_operand.vmem [shape: f32[4,64,64], index: 3, kind: input, shape index: {}]   ;;  %s1281_s4 = inlined_call_operand.vmem [shape: f32[4,1,64], index: 4, kind: input, shape index: {}]   ;;  %s1282_s5 = inlined_call_operand.hbm [shape: f32[4,64,64], index: 5, kind: input, shape index: {}]   ;;  %s1283_s6 = inlined_call_operand.vmem [shape: f32[4,1,64], index: 6, kind: input, shape index: {}]   ;;  %s1284_s7 = inlined_call_operand.vmem [shape: f32[4,64,32], index: 7, kind: input, shape index: {}]   ;;  %s1285_s8 = inlined_call_operand.vmem [shape: f32[4,1,32], index: 8, kind: input, shape index: {}]   ;;  %s1286_s9 = inlined_call_operand.hbm [shape: f32[8,128], index: 9, kind: output, shape index: {}]  }
   0x1   :  { %15 = vsyncpa [#allocation4], 0  ;;  %s30_s11 = sshll.u32 %s1282_s5, 4  ;;  %s891_s12 = smov [#allocation2]   ;;  %s31_s11 = int_to_ptr.hbm [resolvable:$true] %s30_s11 }
   0x2   :  { %s32_s13 = sshll.u32 %s891_s12, 4  ;;  %s892_s14 = smov 128   ;;  %s33_s13 = int_to_ptr.vmem [resolvable:$true] %s32_s13 }
   0x3   :  { %s893_s15 = smov 8  }
   0x4   :  { %38 = dma.hbm_to_vmem [thread:$0]  %s31_s11, 4096, %s33_s13, [#allocation3], %s892_s14, %s892_s14, %s893_s15  }
   0x5   :  { %887 = dma.done.wait [#allocation3], 4096  }
   0x6   :  { %888 = vsyncadd [#allocation3], 4294963200  ;;  %v52_v0 = vld [vmem:[%s1278_s1 + $0x8] sm:$0xff]  ;;  %v51_v1 = vld [vmem:[%s1278_s1] sm:$0xff]  ;;  %vm57_vm0 = vcmask 130048   ;;  %vm96_vm2 = vcmask 523264  }
   0x7   :  { %75 = vmatpush.msra.mxu1 %v52_v0  ;;  %v962_v2 = vld [vmem:[%s1277_s0] sm:$0xff]  ;;  %v91_v3 = vld [vmem:[%s1280_s3 + $0x38] sm:$0xff]  ;;  %v90_v4 = vld [vmem:[%s1280_s3 + $0x30] sm:$0xff]  ;;  %s894_s18 = smov 112   ;;  %v895_v47 = vmov 0.0   ;;  %s896_s5 = smov 16  }
   0x8   :  { %v89_v5 = vld [vmem:[%s1280_s3 + $0x28] sm:$0xff]  ;;  %v88_v6 = vld [vmem:[%s1280_s3 + $0x20] sm:$0xff]  ;;  %v87_v7 = vld [vmem:[%s1280_s3 + $0x18] sm:$0xff]  ;;  %49 = vst [vmem:[#allocation5] sm:$0xff] %v895_v47  ;;  %vm370_vm8 = vcmask 261248   ;;  %vm535_vm12 = vcmask 392448  }
   0x9   :  { %76 = vmatpush.msra.mxu1 %v51_v1  ;;  %v86_v8 = vld [vmem:[%s1280_s3 + $0x10] sm:$0xff]  ;;  %v85_v9 = vld [vmem:[%s1280_s3 + $0x8] sm:$0xff]  ;;  %v84_v10 = vld [vmem:[%s1280_s3] sm:$0xff] }
   0xa   :  { %724 = vmatmul.msk.f32.vlgmr.msra.gmra.mxu1 %vm57_vm0, %v962_v2  ;;  %v130_v11 = vld [vmem:[#allocation2 + $0x38] sm:$0xff]  ;;  %v129_v12 = vld [vmem:[#allocation2 + $0x30] sm:$0xff]  ;;  %v128_v13 = vld [vmem:[#allocation2 + $0x28] sm:$0xff] }
   0xb   :  { %108 = vmatpush.msrb.mxu1 %v91_v3  ;;  %146 = vmatpush.msra.mxu2 %v130_v11  ;;  %v127_v14 = vld [vmem:[#allocation2 + $0x20] sm:$0xff]  ;;  %v126_v15 = vld [vmem:[#allocation2 + $0x18] sm:$0xff]  ;;  %v125_v21 = vld [vmem:[#allocation2 + $0x10] sm:$0xff] }
   0xc   :  { %v815_v16 = vld [vmem:[%s1279_s2] ss:$0 sm:$0xff]  ;;  %v124_v22 = vld [vmem:[#allocation2 + $0x8] sm:$0xff]  ;;  %v168_v24 = vld [vmem:[%s1284_s7 + $0x38] sm:$0xff] }
   0xd   :  { %109 = vmatpush.msrb.mxu1 %v90_v4  ;;  %147 = vmatpush.msra.mxu2 %v129_v12  ;;  %v123_v23 = vld [vmem:[#allocation2] sm:$0xff]  ;;  %v167_v25 = vld [vmem:[%s1284_s7 + $0x30] sm:$0xff]  ;;  %v166_v26 = vld [vmem:[%s1284_s7 + $0x28] sm:$0xff] }
   0xe   :  { %184 = vmatpush.msra.mxu3 %v168_v24  ;;  %v165_v27 = vld [vmem:[%s1284_s7 + $0x20] sm:$0xff]  ;;  %v164_v28 = vld [vmem:[%s1284_s7 + $0x18] sm:$0xff]  ;;  %v163_v34 = vld [vmem:[%s1284_s7 + $0x10] sm:$0xff] }
   0xf   :  { %110 = vmatpush.msrb.mxu1 %v89_v5  ;;  %148 = vmatpush.msra.mxu2 %v128_v13  ;;  %v816_v29 = vld [vmem:[%s1281_s4] ss:$0 sm:$0xff]  ;;  %v162_v35 = vld [vmem:[%s1284_s7 + $0x8] sm:$0xff]  ;;  %v729_v42 = vld [vmem:[%s1278_s1 + $0x18] sm:$0xff] }
  0x10   :  { %185 = vmatpush.msra.mxu3 %v167_v25  ;;  %v161_v36 = vld [vmem:[%s1284_s7] sm:$0xff]  ;;  %231 = vmatpush.msra.mxu0 %v729_v42  ;;  %v728_v46 = vld [vmem:[%s1278_s1 + $0x10] sm:$0xff]  ;;  %v739_v48 = vld [vmem:[%s1280_s3 + $0x78] sm:$0xff] }
  0x11   :  { %111 = vmatpush.msrb.mxu1 %v88_v6  ;;  %149 = vmatpush.msra.mxu2 %v127_v14  ;;  %v817_v37 = vld [vmem:[%s1283_s6] ss:$0 sm:$0xff]  ;;  %v738_v49 = vld [vmem:[%s1280_s3 + $0x70] sm:$0xff]  ;;  %v737_v50 = vld [vmem:[%s1280_s3 + $0x68] sm:$0xff] }
  0x12   :  { %186 = vmatpush.msra.mxu3 %v166_v26  ;;  %v818_v43 = vld [vmem:[%s1285_s8] ss:$0 sm:$0xff]  ;;  %232 = vmatpush.msra.mxu0 %v728_v46  ;;  %v735_v52 = vld [vmem:[%s1280_s3 + $0x58] sm:$0xff]  ;;  %v734_v58 = vld [vmem:[%s1280_s3 + $0x50] sm:$0xff] }
  0x13   :  { %112 = vmatpush.msrb.mxu1 %v87_v7  ;;  %150 = vmatpush.msra.mxu2 %v126_v15  ;;  %v736_v51 = vld [vmem:[%s1280_s3 + $0x60] sm:$0xff]  ;;  %v733_v59 = vld [vmem:[%s1280_s3 + $0x48] sm:$0xff]  ;;  %v288_v61 = vld [vmem:[#allocation2 + $0x78] sm:$0xff] }
  0x14   :  { %187 = vmatpush.msra.mxu3 %v165_v27  ;;  %265 = vmatpush.msrb.mxu0 %v739_v48  ;;  %v732_v60 = vld [vmem:[%s1280_s3 + $0x40] sm:$0xff]  ;;  %v287_v62 = vld [vmem:[#allocation2 + $0x70] sm:$0xff]  ;;  %v286_v63 = vld [vmem:[#allocation2 + $0x68] sm:$0xff] }
  0x15   :  { %113 = vmatpush.msrb.mxu1 %v86_v8  ;;  %151 = vmatpush.msra.mxu2 %v125_v21  ;;  %v285_v0 = vld [vmem:[#allocation2 + $0x60] sm:$0xff]  ;;  %v284_v1 = vld [vmem:[#allocation2 + $0x58] sm:$0xff]  ;;  %v283_v7 = vld [vmem:[#allocation2 + $0x50] sm:$0xff] }
  0x16   :  { %188 = vmatpush.msra.mxu3 %v164_v28  ;;  %266 = vmatpush.msrb.mxu0 %v738_v49  ;;  %v282_v8 = vld [vmem:[#allocation2 + $0x48] sm:$0xff]  ;;  %v750_v11 = vld [vmem:[%s1284_s7 + $0x70] sm:$0xff]  ;;  %v748_v13 = vld [vmem:[%s1284_s7 + $0x60] sm:$0xff] }
  0x17   :  { %114 = vmatpush.msrb.mxu1 %v85_v9  ;;  %152 = vmatpush.msra.mxu2 %v124_v22  ;;  %v281_v9 = vld [vmem:[#allocation2 + $0x40] sm:$0xff]  ;;  %v749_v12 = vld [vmem:[%s1284_s7 + $0x68] sm:$0xff]  ;;  %v747_v14 = vld [vmem:[%s1284_s7 + $0x58] sm:$0xff] }
  0x18   :  { %189 = vmatpush.msra.mxu3 %v163_v34  ;;  %267 = vmatpush.msrb.mxu0 %v737_v50  ;;  %v820_v15 = vld [vmem:[%s1281_s4 + $0x1] ss:$0 sm:$0xff]  ;;  %v745_v21 = vld [vmem:[%s1284_s7 + $0x48] sm:$0xff]  ;;  %v761_v42 = vld [vmem:[%s1280_s3 + $0x98] sm:$0xff] }
  0x19   :  { %115 = vmatpush.msrb.mxu1 %v84_v10  ;;  %153 = vmatpush.msra.mxu2 %v123_v23  ;;  %v751_v10 = vld [vmem:[%s1284_s7 + $0x78] sm:$0xff]  ;;  %v744_v22 = vld [vmem:[%s1284_s7 + $0x40] sm:$0xff]  ;;  %v755_v28 = vld [vmem:[%s1278_s1 + $0x28] sm:$0xff] }
  0x1a   :  { %190 = vmatpush.msra.mxu3 %v162_v35  ;;  %268 = vmatpush.msrb.mxu0 %v736_v51  ;;  %v821_v23 = vld [vmem:[%s1283_s6 + $0x1] ss:$0 sm:$0xff]  ;;  %v759_v46 = vld [vmem:[%s1280_s3 + $0x88] sm:$0xff]  ;;  %v453_v48 = vld [vmem:[#allocation2 + $0xb8] sm:$0xff] }
  0x1b   :  { %305 = vmatpush.msra.mxu1 %v288_v61  ;;  %345 = vmatpush.msrb.mxu2 %v751_v10  ;;  %v758_v47 = vld [vmem:[%s1280_s3 + $0x80] sm:$0xff]  ;;  %v452_v49 = vld [vmem:[#allocation2 + $0xb0] sm:$0xff]  ;;  %v451_v50 = vld [vmem:[#allocation2 + $0xa8] sm:$0xff] }
  0x1c   :  { %191 = vmatpush.msra.mxu3 %v161_v36  ;;  %269 = vmatpush.msrb.mxu0 %v735_v52  ;;  %v450_v51 = vld [vmem:[#allocation2 + $0xa0] sm:$0xff]  ;;  %v449_v52 = vld [vmem:[#allocation2 + $0x98] sm:$0xff] }
  0x1d   :  { %306 = vmatpush.msra.mxu1 %v287_v62  ;;  %346 = vmatpush.msrb.mxu2 %v750_v11  ;;  %v777_v61 = vld [vmem:[%s1284_s7 + $0xb8] sm:$0xff]  ;;  %v776_v62 = vld [vmem:[%s1284_s7 + $0xb0] sm:$0xff]  ;;  %v825_v10 = vld [vmem:[%s1283_s6 + $0x2] ss:$0 sm:$0xff] }
  0x1e   :  { %270 = vmatpush.msrb.mxu0 %v734_v58  ;;  %396 = vmatpush.msrb.mxu3 %v755_v28  ;;  %v448_v58 = vld [vmem:[#allocation2 + $0x90] sm:$0xff]  ;;  %v789_v28 = vld [vmem:[%s1280_s3 + $0xe8] sm:$0xff] }
  0x1f   :  { %307 = vmatpush.msra.mxu1 %v286_v63  ;;  %347 = vmatpush.msrb.mxu2 %v749_v12  ;;  %v775_v63 = vld [vmem:[%s1284_s7 + $0xa8] sm:$0xff] }
  0x20   :  { %271 = vmatpush.msrb.mxu0 %v733_v59  ;;  %v447_v59 = vld [vmem:[#allocation2 + $0x88] sm:$0xff] }
  0x21   :  { %308 = vmatpush.msra.mxu1 %v285_v0  ;;  %348 = vmatpush.msrb.mxu2 %v748_v13  ;;  %v774_v0 = vld [vmem:[%s1284_s7 + $0xa0] sm:$0xff] }
  0x22   :  { %272 = vmatpush.msrb.mxu0 %v732_v60  ;;  %v446_v60 = vld [vmem:[#allocation2 + $0x80] sm:$0xff] }
  0x23   :  { %309 = vmatpush.msra.mxu1 %v284_v1  ;;  %349 = vmatpush.msrb.mxu2 %v747_v14  ;;  %v773_v1 = vld [vmem:[%s1284_s7 + $0x98] sm:$0xff] }
  0x25   :  { %310 = vmatpush.msra.mxu1 %v283_v7  ;;  %v772_v7 = vld [vmem:[%s1284_s7 + $0x90] sm:$0xff] }
  0x27   :  { %311 = vmatpush.msra.mxu1 %v282_v8  ;;  %v771_v8 = vld [vmem:[%s1284_s7 + $0x88] sm:$0xff] }
  0x29   :  { %312 = vmatpush.msra.mxu1 %v281_v9  ;;  %v770_v9 = vld [vmem:[%s1284_s7 + $0x80] sm:$0xff] }
  0x87   :  { %v78_v17 = vpop.f32.mrf.mxu1 }
  0x88   :  { %v79_v18 = vadd.f32 %v815_v16, %v78_v17 }
  0x8a   :  { %vm81_vm1 = vcmp.gt.f32.partialorder %v79_v18, 0.0  ;;  %v82_v19 = vmul.f32 0.2, %v79_v18 }
  0x8c   :  { %v83_v20 = vsel %vm81_vm1, %v79_v18, %v82_v19  ;;  %vm700_vm1 = vcmask 523648  }
  0x8d   :  { %725 = vmatmul.msk.f32.vlgmr.msrb.gmra.mxu1 %vm96_vm2, %v83_v20  ;;  %v746_v20 = vld [vmem:[%s1284_s7 + $0x50] sm:$0xff] }
  0x8e   :  { %350 = vmatpush.msrb.mxu2 %v746_v20  ;;  %510 = vmatpush.msrb.mxu1 %v777_v61  ;;  %v796_v61 = vld [vmem:[%s1284_s7 + $0xc0] sm:$0xff] }
  0x90   :  { %351 = vmatpush.msrb.mxu2 %v745_v21  ;;  %511 = vmatpush.msrb.mxu1 %v776_v62  ;;  %v829_v62 = vld [vmem:[%s1283_s6 + $0x3] ss:$0 sm:$0xff]  ;;  %s898_s6 = smov 48  }
  0x92   :  { %352 = vmatpush.msrb.mxu2 %v744_v22  ;;  %512 = vmatpush.msrb.mxu1 %v775_v63 }
  0x94   :  { %513 = vmatpush.msrb.mxu1 %v774_v0 }
  0x96   :  { %514 = vmatpush.msrb.mxu1 %v773_v1 }
  0x98   :  { %515 = vmatpush.msrb.mxu1 %v772_v7 }
  0x9a   :  { %516 = vmatpush.msrb.mxu1 %v771_v8 }
  0x9c   :  { %517 = vmatpush.msrb.mxu1 %v770_v9 }
 0x10a   :  { %v117_v30 = vpop.f32.mrf.mxu1 }
 0x10b   :  { %v118_v31 = vadd.f32 %v816_v29, %v117_v30  ;;  %v754_v29 = vld [vmem:[%s1278_s1 + $0x20] sm:$0xff] }
 0x10c   :  { %397 = vmatpush.msrb.mxu3 %v754_v29  ;;  %v822_v30 = vld [vmem:[%s1285_s8 + $0x1] ss:$0 sm:$0xff] }
 0x10d   :  { %v121_v32 = vmul.f32 0.2, %v118_v31  ;;  %vm120_vm3 = vcmp.gt.f32.partialorder %v118_v31, 0.0  ;;  %v788_v29 = vld [vmem:[%s1280_s3 + $0xe0] sm:$0xff] }
 0x10f   :  { %v122_v33 = vsel %vm120_vm3, %v118_v31, %v121_v32 }
 0x110   :  { %726 = vmatmul.msk.f32.vlgmr.msra.gmra.mxu2 %vm96_vm2, %v122_v33 }
 0x193   :  { %v155_v38 = vpop.f32.mrf.mxu2 }
 0x194   :  { %v156_v39 = vadd.f32 %v817_v37, %v155_v38  ;;  %v765_v38 = vld [vmem:[%s1280_s3 + $0xb8] sm:$0xff] }
 0x196   :  { %v159_v40 = vmul.f32 0.2, %v156_v39  ;;  %vm158_vm4 = vcmp.gt.f32.partialorder %v156_v39, 0.0 }
 0x198   :  { %v160_v41 = vsel %vm158_vm4, %v156_v39, %v159_v40  ;;  %v764_v39 = vld [vmem:[%s1280_s3 + $0xb0] sm:$0xff]  ;;  %v763_v40 = vld [vmem:[%s1280_s3 + $0xa8] sm:$0xff] }
 0x199   :  { %727 = vmatmul.msk.f32.vlgmr.msra.gmra.mxu3 %vm96_vm2, %v160_v41  ;;  %v762_v41 = vld [vmem:[%s1280_s3 + $0xa0] sm:$0xff] }
 0x19a   :  { %430 = vmatpush.msra.mxu3 %v765_v38  ;;  %v615_v38 = vld [vmem:[#allocation2 + $0xe0] sm:$0xff] }
 0x19c   :  { %431 = vmatpush.msra.mxu3 %v764_v39  ;;  %v614_v39 = vld [vmem:[#allocation2 + $0xd8] sm:$0xff] }
 0x19e   :  { %432 = vmatpush.msra.mxu3 %v763_v40  ;;  %v827_v40 = vld [vmem:[%s1279_s2 + $0x3] ss:$0 sm:$0xff] }
 0x1a0   :  { %433 = vmatpush.msra.mxu3 %v762_v41 }
 0x1a2   :  { %434 = vmatpush.msra.mxu3 %v761_v42 }
 0x21c   :  { %v193_v44 = vpop.f32.mrf.mxu3 }
 0x21d   :  { %v1032_v45 = vadd.f32 %v818_v43, %v193_v44  ;;  %v760_v44 = vld [vmem:[%s1280_s3 + $0x90] sm:$0xff] }
 0x21e   :  { %435 = vmatpush.msra.mxu3 %v760_v44 }
 0x21f   :  { %200 = vrot.lane.b32.xlu0 %v1032_v45, %s894_s18  ;;  %v196_v53 = vmul.f32 1.442695, %v1032_v45 }
 0x220   :  { %436 = vmatpush.msra.mxu3 %v759_v46  ;;  %v613_v46 = vld [vmem:[#allocation2 + $0xd0] sm:$0xff] }
 0x221   :  { %831 = vpow2.f32 %v196_v53  ;;  %v823_v53 = vld [vmem:[%s1279_s2 + $0x2] ss:$0 sm:$0xff] }
 0x222   :  { %437 = vmatpush.msra.mxu3 %v758_v47  ;;  %v612_v47 = vld [vmem:[#allocation2 + $0xc8] sm:$0xff] }
 0x227   :  { %v832_v54 = vpop.eup %831 }
 0x228   :  { %v198_v55 = vmul.f32 %v832_v54, %v962_v2  ;;  %v819_v2 = vld [vmem:[%s1279_s2 + $0x1] ss:$0 sm:$0xff] }
 0x291   :  { %v201_v56 = vpop.permute.xlu0 %200 }
 0x292   :  { %v1056_v57 = vadd.f32 %v201_v56, %v198_v55 }
 0x294   :  { %731 = vmatmul.msk.f32.vlgmr.msra.gmra.mxu0 %vm57_vm0, %v1056_v57  ;;  %205 = vst.msk [vmem:[#allocation5] sm:$0xff] %vm57_vm0, %v1056_v57 }
 0x295   :  { %470 = vmatpush.msra.mxu0 %v453_v48  ;;  %v611_v48 = vld [vmem:[#allocation2 + $0xc0] sm:$0xff] }
 0x297   :  { %471 = vmatpush.msra.mxu0 %v452_v49  ;;  %v803_v49 = vld [vmem:[%s1284_s7 + $0xf8] sm:$0xff] }
 0x299   :  { %472 = vmatpush.msra.mxu0 %v451_v50  ;;  %v802_v50 = vld [vmem:[%s1284_s7 + $0xf0] sm:$0xff] }
 0x29b   :  { %473 = vmatpush.msra.mxu0 %v450_v51  ;;  %v801_v51 = vld [vmem:[%s1284_s7 + $0xe8] sm:$0xff] }
 0x29d   :  { %474 = vmatpush.msra.mxu0 %v449_v52  ;;  %v800_v52 = vld [vmem:[%s1284_s7 + $0xe0] sm:$0xff] }
 0x29f   :  { %475 = vmatpush.msra.mxu0 %v448_v58 }
 0x2a1   :  { %476 = vmatpush.msra.mxu0 %v447_v59  ;;  %v798_v59 = vld [vmem:[%s1284_s7 + $0xd0] sm:$0xff] }
 0x2a3   :  { %477 = vmatpush.msra.mxu0 %v446_v60  ;;  %v797_v60 = vld [vmem:[%s1284_s7 + $0xc8] sm:$0xff] }
 0x311   :  { %v234_v3 = vpop.f32.mrf.mxu0 }
 0x312   :  { %v235_v4 = vadd.f32 %v819_v2, %v234_v3  ;;  %v824_v2 = vld [vmem:[%s1281_s4 + $0x2] ss:$0 sm:$0xff] }
 0x314   :  { %vm237_vm5 = vcmp.gt.f32.partialorder %v235_v4, 0.0  ;;  %v238_v5 = vmul.f32 0.2, %v235_v4 }
 0x316   :  { %v239_v6 = vsel %vm237_vm5, %v235_v4, %v238_v5 }
 0x317   :  { %741 = vmatmul.msk.f32.vlgmr.msrb.gmra.mxu0 %vm96_vm2, %v239_v6 }
 0x318   :  { %675 = vmatpush.msrb.mxu0 %v803_v49 }
 0x31a   :  { %676 = vmatpush.msrb.mxu0 %v802_v50 }
 0x31c   :  { %677 = vmatpush.msrb.mxu0 %v801_v51 }
 0x31e   :  { %678 = vmatpush.msrb.mxu0 %v800_v52 }
 0x394   :  { %v274_v16 = vpop.f32.mrf.mxu0 }
 0x395   :  { %v275_v17 = vadd.f32 %v820_v15, %v274_v16  ;;  %v781_v15 = vld [vmem:[%s1278_s1 + $0x38] sm:$0xff]  ;;  %v780_v16 = vld [vmem:[%s1278_s1 + $0x30] sm:$0xff]  ;;  %s897_s1 = smov 32  }
 0x396   :  { %561 = vmatpush.msra.mxu2 %v781_v15 }
 0x397   :  { %vm277_vm6 = vcmp.gt.f32.partialorder %v275_v17, 0.0  ;;  %v278_v18 = vmul.f32 0.2, %v275_v17 }
 0x398   :  { %562 = vmatpush.msra.mxu2 %v780_v16 }
 0x399   :  { %v279_v19 = vsel %vm277_vm6, %v275_v17, %v278_v18  ;;  %v826_v17 = vld [vmem:[%s1285_s8 + $0x2] ss:$0 sm:$0xff] }
 0x39a   :  { %743 = vmatmul.msk.f32.vlgmr.msra.gmra.mxu1 %vm96_vm2, %v279_v19 }
 0x417   :  { %v314_v24 = vpop.f32.mrf.mxu1 }
 0x418   :  { %v315_v25 = vadd.f32 %v821_v23, %v314_v24 }
 0x41a   :  { %vm317_vm7 = vcmp.gt.f32.partialorder %v315_v25, 0.0  ;;  %v318_v26 = vmul.f32 0.2, %v315_v25 }
 0x41c   :  { %v319_v27 = vsel %vm317_vm7, %v315_v25, %v318_v26 }
 0x41d   :  { %753 = vmatmul.msk.f32.vlgmr.msrb.gmra.mxu2 %vm96_vm2, %v319_v27  ;;  %v790_v27 = vld [vmem:[%s1280_s3 + $0xf0] sm:$0xff] }
 0x4a0   :  { %v354_v31 = vpop.f32.mrf.mxu2 }
 0x4a1   :  { %v1116_v32 = vadd.f32 %v822_v30, %v354_v31  ;;  %v787_v30 = vld [vmem:[%s1280_s3 + $0xd8] sm:$0xff] }
 0x4a3   :  { %361 = vrot.lane.b32.xlu0 %v1116_v32, %s894_s18  ;;  %v357_v33 = vmul.f32 1.442695, %v1116_v32  ;;  %v365_v19 = vadd.f32 %v1116_v32, %v1032_v45  ;;  %v791_v45 = vld [vmem:[%s1280_s3 + $0xf8] sm:$0xff]  ;;  %v786_v32 = vld [vmem:[%s1280_s3 + $0xd0] sm:$0xff] }
 0x4a4   :  { %595 = vmatpush.msrb.mxu2 %v791_v45 }
 0x4a5   :  { %833 = vpow2.f32 %v357_v33  ;;  %v785_v33 = vld [vmem:[%s1280_s3 + $0xc8] sm:$0xff] }
 0x4a6   :  { %596 = vmatpush.msrb.mxu2 %v790_v27 }
 0x4a8   :  { %597 = vmatpush.msrb.mxu2 %v789_v28 }
 0x4aa   :  { %598 = vmatpush.msrb.mxu2 %v788_v29 }
 0x4ab   :  { %v834_v34 = vpop.eup %833 }
 0x4ac   :  { %v359_v35 = vmul.f32 %v834_v34, %v1056_v57  ;;  %599 = vmatpush.msrb.mxu2 %v787_v30  ;;  %v784_v34 = vld [vmem:[%s1280_s3 + $0xc0] sm:$0xff] }
 0x4ae   :  { %600 = vmatpush.msrb.mxu2 %v786_v32 }
 0x4b0   :  { %601 = vmatpush.msrb.mxu2 %v785_v33 }
 0x4b2   :  { %602 = vmatpush.msrb.mxu2 %v784_v34 }
 0x515   :  { %v362_v36 = vpop.permute.xlu0 %361 }
 0x516   :  { %v1122_v37 = vadd.f32 %v362_v36, %v359_v35  ;;  %v618_v35 = vld [vmem:[#allocation2 + $0xf8] sm:$0xff]  ;;  %v617_v36 = vld [vmem:[#allocation2 + $0xf0] sm:$0xff] }
 0x518   :  { %367 = vrot.lane.b32.xlu2 %v1122_v37, %s896_s5  ;;  %757 = vmatmul.msk.f32.vlgmr.msrb.gmra.mxu3 %vm57_vm0, %v1122_v37 }
 0x519   :  { %635 = vmatpush.msrb.mxu3 %v618_v35 }
 0x51b   :  { %636 = vmatpush.msrb.mxu3 %v617_v36 }
 0x572   :  { %v368_v43 = vpop.permute.xlu2 %367 }
 0x573   :  { %371 = vst.msk [vmem:[#allocation5] sm:$0xff] %vm370_vm8, %v368_v43 }
 0x59b   :  { %v399_v54 = vpop.f32.mrf.mxu3 }
 0x59c   :  { %v400_v55 = vadd.f32 %v823_v53, %v399_v54  ;;  %v799_v53 = vld [vmem:[%s1284_s7 + $0xd8] sm:$0xff]  ;;  %v828_v54 = vld [vmem:[%s1281_s4 + $0x3] ss:$0 sm:$0xff]  ;;  %s899_s7 = smov [#allocation5]  }
 0x59d   :  { %679 = vmatpush.msrb.mxu0 %v799_v53 }
 0x59e   :  { %vm402_vm9 = vcmp.gt.f32.partialorder %v400_v55, 0.0  ;;  %v403_v56 = vmul.f32 0.2, %v400_v55 }
 0x59f   :  { %680 = vmatpush.msrb.mxu0 %v798_v59 }
 0x5a0   :  { %v404_v57 = vsel %vm402_vm9, %v400_v55, %v403_v56 }
 0x5a1   :  { %767 = vmatmul.msk.f32.vlgmr.msra.gmra.mxu3 %vm96_vm2, %v404_v57  ;;  %681 = vmatpush.msrb.mxu0 %v797_v60 }
 0x5a3   :  { %682 = vmatpush.msrb.mxu0 %v796_v61 }
 0x624   :  { %v439_v3 = vpop.f32.mrf.mxu3 }
 0x625   :  { %v440_v4 = vadd.f32 %v824_v2, %v439_v3  ;;  %v830_v3 = vld [vmem:[%s1285_s8 + $0x3] ss:$0 sm:$0xff]  ;;  %s712_s8 = sshll.u32 %s899_s7, 4  ;;  %s713_s8 = int_to_ptr.vmem [resolvable:$true] %s712_s8 }
 0x627   :  { %vm442_vm10 = vcmp.gt.f32.partialorder %v440_v4, 0.0  ;;  %v443_v5 = vmul.f32 0.2, %v440_v4 }
 0x629   :  { %v444_v6 = vsel %vm442_vm10, %v440_v4, %v443_v5 }
 0x62a   :  { %769 = vmatmul.msk.f32.vlgmr.msra.gmra.mxu0 %vm96_vm2, %v444_v6 }
 0x6a7   :  { %v479_v11 = vpop.f32.mrf.mxu0 }
 0x6a8   :  { %v480_v12 = vadd.f32 %v825_v10, %v479_v11 }
 0x6aa   :  { %vm482_vm11 = vcmp.gt.f32.partialorder %v480_v12, 0.0  ;;  %v483_v13 = vmul.f32 0.2, %v480_v12 }
 0x6ac   :  { %v484_v14 = vsel %vm482_vm11, %v480_v12, %v483_v13 }
 0x6ad   :  { %779 = vmatmul.msk.f32.vlgmr.msrb.gmra.mxu1 %vm96_vm2, %v484_v14 }
 0x72a   :  { %v519_v18 = vpop.f32.mrf.mxu1 }
 0x72b   :  { %v520_v20 = vadd.f32 %v826_v17, %v519_v18 }
 0x72d   :  { %526 = vrot.lane.b32.xlu1 %v520_v20, %s894_s18  ;;  %v1199_v21 = vadd.f32 %v520_v20, %v365_v19  ;;  %v522_v22 = vmul.f32 1.442695, %v520_v20 }
 0x72f   :  { %835 = vpow2.f32 %v522_v22 }
 0x735   :  { %v836_v23 = vpop.eup %835 }
 0x736   :  { %v524_v24 = vmul.f32 %v836_v23, %v1122_v37  ;;  %v616_v37 = vld [vmem:[#allocation2 + $0xe8] sm:$0xff] }
 0x737   :  { %637 = vmatpush.msrb.mxu3 %v616_v37 }
 0x739   :  { %638 = vmatpush.msrb.mxu3 %v615_v38 }
 0x73b   :  { %639 = vmatpush.msrb.mxu3 %v614_v39 }
 0x73d   :  { %640 = vmatpush.msrb.mxu3 %v613_v46 }
 0x73f   :  { %641 = vmatpush.msrb.mxu3 %v612_v47 }
 0x741   :  { %642 = vmatpush.msrb.mxu3 %v611_v48 }
 0x79f   :  { %v527_v25 = vpop.permute.xlu1 %526 }
 0x7a0   :  { %v1202_v26 = vadd.f32 %v527_v25, %v524_v24 }
 0x7a2   :  { %532 = vrot.lane.b32.xlu2 %v1202_v26, %s897_s1  ;;  %783 = vmatmul.msk.f32.vlgmr.msra.gmra.mxu2 %vm57_vm0, %v1202_v26 }
 0x7fc   :  { %v533_v31 = vpop.permute.xlu2 %532 }
 0x7fd   :  { %536 = vst.msk [vmem:[#allocation5] sm:$0xff] %vm535_vm12, %v533_v31 }
 0x825   :  { %v564_v41 = vpop.f32.mrf.mxu2 }
 0x826   :  { %v565_v42 = vadd.f32 %v827_v40, %v564_v41 }
 0x828   :  { %vm567_vm13 = vcmp.gt.f32.partialorder %v565_v42, 0.0  ;;  %v568_v43 = vmul.f32 0.2, %v565_v42 }
 0x82a   :  { %v569_v44 = vsel %vm567_vm13, %v565_v42, %v568_v43 }
 0x82b   :  { %793 = vmatmul.msk.f32.vlgmr.msrb.gmra.mxu2 %vm96_vm2, %v569_v44 }
 0x8ae   :  { %v604_v55 = vpop.f32.mrf.mxu2 }
 0x8af   :  { %v605_v56 = vadd.f32 %v828_v54, %v604_v55 }
 0x8b1   :  { %vm607_vm14 = vcmp.gt.f32.partialorder %v605_v56, 0.0  ;;  %v608_v57 = vmul.f32 0.2, %v605_v56 }
 0x8b3   :  { %v609_v58 = vsel %vm607_vm14, %v605_v56, %v608_v57 }
 0x8b4   :  { %795 = vmatmul.msk.f32.vlgmr.msrb.gmra.mxu3 %vm96_vm2, %v609_v58 }
 0x937   :  { %v644_v63 = vpop.f32.mrf.mxu3 }
 0x938   :  { %v645_v0 = vadd.f32 %v829_v62, %v644_v63 }
 0x93a   :  { %vm647_vm15 = vcmp.gt.f32.partialorder %v645_v0, 0.0  ;;  %v648_v1 = vmul.f32 0.2, %v645_v0 }
 0x93c   :  { %v649_v2 = vsel %vm647_vm15, %v645_v0, %v648_v1 }
 0x93d   :  { %805 = vmatmul.msk.f32.vlgmr.msrb.gmra.mxu0 %vm96_vm2, %v649_v2  ;;  %vm705_vm2 = vcmask 531968  }
 0x9ba   :  { %v684_v4 = vpop.f32.mrf.mxu0 }
 0x9bb   :  { %v685_v5 = vadd.f32 %v830_v3, %v684_v4 }
 0x9bd   :  { %691 = vrot.lane.b32.xlu1 %v685_v5, %s894_s18  ;;  %v695_v6 = vadd.f32 %v685_v5, %v1199_v21  ;;  %v687_v8 = vmul.f32 1.442695, %v685_v5  ;;  %s714_s18 = sshll.u32 %s1286_s9, 4  ;;  %s715_s18 = int_to_ptr.hbm [resolvable:$true] %s714_s18 }
 0x9bf   :  { %v702_v7 = vsel %vm57_vm0, %v695_v6, 0.0  ;;  %837 = vpow2.f32 %v687_v8 }
 0x9c5   :  { %v838_v9 = vpop.eup %837 }
 0x9c6   :  { %v689_v10 = vmul.f32 %v838_v9, %v1202_v26 }
 0x9e7   :  { %703 = vadd.xlane.f32.xlu1 %v702_v7 }
 0xa2f   :  { %v692_v11 = vpop.permute.xlu1 %691 }
 0xa30   :  { %v694_v12 = vadd.f32 %v692_v11, %v689_v10 }
 0xa32   :  { %697 = vrot.lane.b32.xlu0 %v694_v12, %s898_s6 }
 0xa5a   :  { %v704_v14 = vpop.xlane.xlu1 %703 }
 0xaa4   :  { %v698_v13 = vpop.permute.xlu0 %697 }
 0xaa5   :  { %701 = vst.msk [vmem:[#allocation5] sm:$0xff] %vm700_vm1, %v698_v13 }
 0xaa6   :  { %706 = vst.msk [vmem:[#allocation5] sm:$0xff] %vm705_vm2, %v704_v14 }
 0xaa7   :  { %717 = dma.vmem_to_hbm [thread:$0]  %s713_s8, 128, %s715_s18, [#allocation4]  }
 0xaa8   :  { %889 = dma.done.wait [#allocation4], 128  }
 0xaa9   :  { %890 = vsyncadd [#allocation4], 4294967168 }
 0xaaa   :  { %722 = vsyncpa [#allocation3], 1 }
 0xaab   :  { %723 = vsyncpa [#allocation4], 1 }

</bundles_post_ra>
